<compile_context>
chip_gen: v7x
topology: tpu7x:2x2x1
jax: 0.10.0
libtpu: 0.0.40
codegen_flags: <defaults>
</compile_context>

<pallas_src>
import jax
import jax.numpy as jnp
from jax.experimental import pallas as pl
from jax.experimental.pallas import tpu as pltpu

# ---- synthetic, small hyper-parameters implied by the module ----
N_ITEMS  = 3    # shapeglot triplet: 3 candidate shapes per example
N_SHAPES = 10   # rows of the precomputed image-feature table
IMG_FEAT = 16   # raw image-feature dim (F)
EMB_DIM  = 32   # word-embedding dim == projected visual dim (E)
HIDDEN   = 32   # LSTM hidden size (H)
MLP_HID  = 32   # logit-MLP hidden size (M)
VOCAB    = 20
SEQ_LEN  = 8
BATCH    = 2
LANES    = 128  # lane-padded output width (== 4*HIDDEN)

# ---- packed-slab row offsets ----
# Slab W: lane width 128 (f32)
W_IH_OFF   = 0                       # (EMB_DIM, 4H)
W_HH_OFF   = W_IH_OFF + EMB_DIM      # (HIDDEN, 4H)
W2_OFF     = W_HH_OFF + HIDDEN       # (MLP_HID, 128)  W2 lane-padded
B_LSTM_OFF = W2_OFF + MLP_HID        # (1, 4H), placed on an 8-row boundary
B2_OFF     = B_LSTM_OFF + 8          # (1, 128), lane-padded b2
WSLAB_ROWS = B2_OFF + 8              # 112

# Slab S: lane width EMB_DIM == MLP_HID == 32 (f32)
W_IMG_OFF  = 0                       # (IMG_FEAT, EMB_DIM)
W1_OFF     = W_IMG_OFF + IMG_FEAT    # (HIDDEN, MLP_HID)
B_IMG_OFF  = W1_OFF + HIDDEN         # (1, EMB_DIM)
B1_OFF     = B_IMG_OFF + 8           # (1, MLP_HID)
SSLAB_ROWS = B1_OFF + 8              # 64


def _sigmoid1(x):
    # single-EUP sigmoid: sigmoid(x) = 0.5 * (1 + tanh(x / 2))
    return 0.5 * jnp.tanh(0.5 * x) + 0.5


def listener_kernel(img_ref, xw_ref, wslab_ref, sslab_ref, out_ref):
    """All (item, batch) rows processed together in one invocation (no grid)."""
    R = img_ref.shape[0]                  # padded rows (n_items*B -> 8)
    T = xw_ref.shape[0] // R              # number of word tokens
    H = HIDDEN

    # ---- unpack the two parameter slabs (static sublane slices) ----
    w_ih   = wslab_ref[W_IH_OFF:W_IH_OFF + EMB_DIM, :]     # (E, 4H)
    w_hh   = wslab_ref[W_HH_OFF:W_HH_OFF + HIDDEN, :]      # (H, 4H)
    w2p    = wslab_ref[W2_OFF:W2_OFF + MLP_HID, :]         # (M, 128) lane-padded
    b_lstm = wslab_ref[B_LSTM_OFF:B_LSTM_OFF + 1, :]       # (1, 4H)
    b2p    = wslab_ref[B2_OFF:B2_OFF + 1, :]               # (1, 128) lane-padded

    w_img  = sslab_ref[W_IMG_OFF:W_IMG_OFF + IMG_FEAT, :]  # (F, E)
    w1     = sslab_ref[W1_OFF:W1_OFF + HIDDEN, :]          # (H, M)
    b_img  = sslab_ref[B_IMG_OFF:B_IMG_OFF + 1, :]         # (1, E)
    b1     = sslab_ref[B1_OFF:B1_OFF + 1, :]               # (1, M)

    # ---- image_encoder: Linear(F->E) + ReLU, all items at once ----
    # TODO(synk): F.dropout(dropout_rate) of the original encoders is omitted
    # (deterministic / eval-mode forward).
    v = jnp.dot(img_ref[...], w_img, preferred_element_type=jnp.float32)
    v = jnp.maximum(v + b_img, 0.0)                                  # (R, E)

    # ---- fused, hoisted LSTM input projection (one matmul, bias folded in) ----
    # rows: [visual token (R)] then [word token t=0..T-1 (R each)]
    x_all = jnp.concatenate([v, xw_ref[...]], axis=0)                # ((T+1)*R, E)
    xp = jnp.dot(x_all, w_ih, preferred_element_type=jnp.float32) + b_lstm  # ((T+1)*R, 4H)

    h = jnp.zeros((R, H), jnp.float32)
    c = jnp.zeros((R, H), jnp.float32)

    def lstm_step(xp_t, h, c):
        # serial chain: one (R,H)x(H,4H) matmul + 3 full-vreg EUP pushes per step
        gates = xp_t + jnp.dot(h, w_hh, preferred_element_type=jnp.float32)  # (R, 4H)
        sg = _sigmoid1(gates)            # one EUP pass over the full 128-lane vreg
        tg = jnp.tanh(gates)             # one EUP pass over the full 128-lane vreg
        i_g = sg[:, 0 * H:1 * H]
        f_g = sg[:, 1 * H:2 * H]
        g_g = tg[:, 2 * H:3 * H]
        o_g = sg[:, 3 * H:4 * H]
        c_new = f_g * c + i_g * g_g
        h_new = o_g * jnp.tanh(c_new)
        return h_new, c_new

    # visual feature is the first "word" of the sequence; static unroll over T words
    h, c = lstm_step(xp[0:R, :], h, c)
    for t in range(T):
        h, c = lstm_step(xp[(t + 1) * R:(t + 2) * R, :], h, c)

    # ---- logit_encoder: MLP  H -> M -> 1 (lane-padded to 128, unmasked store) ----
    hid = jnp.maximum(
        jnp.dot(h, w1, preferred_element_type=jnp.float32) + b1, 0.0)      # (R, M)
    out_ref[...] = (jnp.dot(hid, w2p, preferred_element_type=jnp.float32)
                    + b2p).astype(out_ref.dtype)                            # (R, 128)


def _pack_slabs(params):
    """Pack the 9 small parameter tensors into two lane-dense slabs."""
    wslab = jnp.zeros((WSLAB_ROWS, LANES), jnp.float32)
    wslab = wslab.at[W_IH_OFF:W_IH_OFF + EMB_DIM, :].set(params["w_ih"])
    wslab = wslab.at[W_HH_OFF:W_HH_OFF + HIDDEN, :].set(params["w_hh"])
    w2p = jnp.pad(params["w2"], ((0, 0), (0, LANES - params["w2"].shape[1])))
    b2p = jnp.pad(params["b2"], ((0, 0), (0, LANES - params["b2"].shape[1])))
    wslab = wslab.at[W2_OFF:W2_OFF + MLP_HID, :].set(w2p)
    wslab = wslab.at[B_LSTM_OFF:B_LSTM_OFF + 1, :].set(params["b_lstm"])
    wslab = wslab.at[B2_OFF:B2_OFF + 1, :].set(b2p)

    sslab = jnp.zeros((SSLAB_ROWS, EMB_DIM), jnp.float32)
    sslab = sslab.at[W_IMG_OFF:W_IMG_OFF + IMG_FEAT, :].set(params["w_img"])
    sslab = sslab.at[W1_OFF:W1_OFF + HIDDEN, :].set(params["w1"])
    sslab = sslab.at[B_IMG_OFF:B_IMG_OFF + 1, :].set(params["b_img"])
    sslab = sslab.at[B1_OFF:B1_OFF + 1, :].set(params["b1"])
    return wslab, sslab


def listener_forward(params, item_ids, padded_tokens, dropout_rate=0.5):
    # TODO(synk): dropout_rate is accepted but ignored (eval-mode forward).
    B, n_items = item_ids.shape
    T = padded_tokens.shape[1]
    R = n_items * B
    R_pad = max(8, -(-R // 8) * 8)

    # ---- glue: embedding lookups (gathers) + item replication in plain JAX ----
    # rows are item-major: row r = i*B + b
    img = jnp.take(params["img_table"], item_ids, axis=0)          # (B, n_items, F)
    img = jnp.transpose(img, (1, 0, 2)).reshape(R, IMG_FEAT)       # (R, F)
    img = jnp.pad(img, ((0, R_pad - R), (0, 0)))                   # (R_pad, F)

    wemb = jnp.take(params["word_emb"], padded_tokens, axis=0)     # (B, T, E)
    wemb = jnp.transpose(wemb, (1, 0, 2))                          # (T, B, E)
    wemb = jnp.tile(wemb[:, None, :, :], (1, n_items, 1, 1))       # (T, n_items, B, E)
    wemb = wemb.reshape(T, R, EMB_DIM)
    wemb = jnp.pad(wemb, ((0, 0), (0, R_pad - R), (0, 0)))
    wemb = wemb.reshape(T * R_pad, EMB_DIM)                        # (T*R_pad, E)

    wslab, sslab = _pack_slabs(params)

    out = pl.pallas_call(
        listener_kernel,
        out_shape=jax.ShapeDtypeStruct((R_pad, LANES), jnp.float32),
        in_specs=[
            pl.BlockSpec(memory_space=pltpu.MemorySpace.VMEM),  # raw image feats
            pl.BlockSpec(memory_space=pltpu.MemorySpace.VMEM),  # word embeddings
            pl.BlockSpec(memory_space=pltpu.MemorySpace.VMEM),  # 128-lane param slab
            pl.BlockSpec(memory_space=pltpu.MemorySpace.VMEM),  # 32-lane param slab
        ],
        out_specs=pl.BlockSpec(memory_space=pltpu.MemorySpace.VMEM),
    )(img, wemb, wslab, sslab)

    # rows r = i*B + b, logit in lane 0 -> (n_items, B) -> (B, n_items) == torch.cat(logits, 1)
    return jnp.transpose(out[:R, 0].reshape(n_items, B), (1, 0))


def init_params(key):
    ks = jax.random.split(key, 8)
    s = 0.1
    word_emb = jax.random.normal(ks[1], (VOCAB, EMB_DIM), jnp.float32) * s
    word_emb = word_emb.at[0].set(0.0)  # nn.Embedding(padding_idx=0)
    return dict(
        img_table=jax.random.normal(ks[0], (N_SHAPES, IMG_FEAT), jnp.float32) * s,
        word_emb=word_emb,
        w_img=jax.random.normal(ks[2], (IMG_FEAT, EMB_DIM), jnp.float32) * s,
        b_img=jnp.zeros((1, EMB_DIM), jnp.float32),
        # fused gate layout (i,f,g,o) along the last dim; bias = b_ih + b_hh
        w_ih=jax.random.normal(ks[3], (EMB_DIM, 4 * HIDDEN), jnp.float32) * s,
        w_hh=jax.random.normal(ks[4], (HIDDEN, 4 * HIDDEN), jnp.float32) * s,
        b_lstm=jnp.zeros((1, 4 * HIDDEN), jnp.float32),
        w1=jax.random.normal(ks[5], (HIDDEN, MLP_HID), jnp.float32) * s,
        b1=jnp.zeros((1, MLP_HID), jnp.float32),
        w2=jax.random.normal(ks[6], (MLP_HID, 1), jnp.float32) * s,
        b2=jnp.zeros((1, 1), jnp.float32),
    )


if __name__ == "__main__":
    key = jax.random.PRNGKey(0)
    pkey, ikey, tkey = jax.random.split(key, 3)
    params = init_params(pkey)
    item_ids = jax.random.randint(ikey, (BATCH, N_ITEMS), 0, N_SHAPES, dtype=jnp.int32)
    padded_tokens = jax.random.randint(tkey, (BATCH, SEQ_LEN), 0, VOCAB, dtype=jnp.int32)

    logits = jax.jit(listener_forward)(params, item_ids, padded_tokens)
    logits = jax.block_until_ready(logits)
    assert logits.shape == (BATCH, N_ITEMS) and logits.dtype == jnp.float32
    print("KERNEL_OK")
</pallas_src>

<mosaic_0001>
module attributes {stable_mosaic.version = 11 : i64} {
  func.func @listener_kernel(%arg0: memref<8x16xf32, #tpu.memory_space<vmem>>, %arg1: memref<64x32xf32, #tpu.memory_space<vmem>>, %arg2: memref<112x128xf32, #tpu.memory_space<vmem>>, %arg3: memref<64x32xf32, #tpu.memory_space<vmem>>, %arg4: memref<8x128xf32, #tpu.memory_space<vmem>>) attributes {dimension_semantics = [], scalar_prefetch = 0 : i64, scratch_operands = 0 : i64, tpu.core_type = #tpu.core_type<tc>} {
    %c0 = arith.constant 0 : index
    %c0_0 = arith.constant 0 : index
    %0 = vector.load %arg2[%c0, %c0_0] : memref<112x128xf32, #tpu.memory_space<vmem>>, vector<32x128xf32>
    %c32 = arith.constant 32 : index
    %c0_1 = arith.constant 0 : index
    %1 = vector.load %arg2[%c32, %c0_1] : memref<112x128xf32, #tpu.memory_space<vmem>>, vector<32x128xf32>
    %c64 = arith.constant 64 : index
    %c0_2 = arith.constant 0 : index
    %2 = vector.load %arg2[%c64, %c0_2] : memref<112x128xf32, #tpu.memory_space<vmem>>, vector<32x128xf32>
    %c96 = arith.constant 96 : index
    %c0_3 = arith.constant 0 : index
    %3 = vector.load %arg2[%c96, %c0_3] : memref<112x128xf32, #tpu.memory_space<vmem>>, vector<1x128xf32>
    %c104 = arith.constant 104 : index
    %c0_4 = arith.constant 0 : index
    %4 = vector.load %arg2[%c104, %c0_4] : memref<112x128xf32, #tpu.memory_space<vmem>>, vector<1x128xf32>
    %c0_5 = arith.constant 0 : index
    %c0_6 = arith.constant 0 : index
    %5 = vector.load %arg3[%c0_5, %c0_6] : memref<64x32xf32, #tpu.memory_space<vmem>>, vector<16x32xf32>
    %c16 = arith.constant 16 : index
    %c0_7 = arith.constant 0 : index
    %6 = vector.load %arg3[%c16, %c0_7] : memref<64x32xf32, #tpu.memory_space<vmem>>, vector<32x32xf32>
    %c48 = arith.constant 48 : index
    %c0_8 = arith.constant 0 : index
    %7 = vector.load %arg3[%c48, %c0_8] : memref<64x32xf32, #tpu.memory_space<vmem>>, vector<1x32xf32>
    %c56 = arith.constant 56 : index
    %c0_9 = arith.constant 0 : index
    %8 = vector.load %arg3[%c56, %c0_9] : memref<64x32xf32, #tpu.memory_space<vmem>>, vector<1x32xf32>
    %c0_10 = arith.constant 0 : index
    %c0_11 = arith.constant 0 : index
    %9 = vector.load %arg0[%c0_10, %c0_11] : memref<8x16xf32, #tpu.memory_space<vmem>>, vector<8x16xf32>
    %cst = arith.constant dense<0.000000e+00> : vector<8x32xf32>
    %10 = tpu.matmul %9, %5, %cst {dimension_numbers = #tpu.dot_dimension_numbers<[1], [0], [0], [1], [0, 0, 1, 1], [], []>} : vector<8x16xf32>, vector<16x32xf32>, vector<8x32xf32> -> vector<8x32xf32>
    %11 = vector.broadcast %7 : vector<1x32xf32> to vector<8x32xf32>
    %12 = arith.addf %10, %11 : vector<8x32xf32>
    %cst_12 = arith.constant 0.000000e+00 : f32
    %13 = vector.broadcast %cst_12 : f32 to vector<8x32xf32>
    %14 = arith.maximumf %12, %13 : vector<8x32xf32>
    %c0_13 = arith.constant 0 : index
    %c0_14 = arith.constant 0 : index
    %15 = vector.load %arg1[%c0_13, %c0_14] : memref<64x32xf32, #tpu.memory_space<vmem>>, vector<64x32xf32>
    %16 = tpu.concatenate %14, %15 in 0 : vector<8x32xf32>, vector<64x32xf32> -> vector<72x32xf32>
    %cst_15 = arith.constant dense<0.000000e+00> : vector<72x128xf32>
    %17 = tpu.matmul %16, %0, %cst_15 {dimension_numbers = #tpu.dot_dimension_numbers<[1], [0], [0], [1], [0, 0, 1, 1], [], []>} : vector<72x32xf32>, vector<32x128xf32>, vector<72x128xf32> -> vector<72x128xf32>
    %18 = vector.broadcast %3 : vector<1x128xf32> to vector<72x128xf32>
    %19 = arith.addf %17, %18 : vector<72x128xf32>
    %cst_16 = arith.constant 0.000000e+00 : f32
    %20 = vector.broadcast %cst_16 : f32 to vector<8x32xf32>
    %cst_17 = arith.constant 0.000000e+00 : f32
    %21 = vector.broadcast %cst_17 : f32 to vector<8x32xf32>
    %22 = vector.extract_strided_slice %19 {offsets = [0, 0], sizes = [8, 128], strides = [1, 1]} : vector<72x128xf32> to vector<8x128xf32>
    %cst_18 = arith.constant dense<0.000000e+00> : vector<8x128xf32>
    %23 = tpu.matmul %20, %1, %cst_18 {dimension_numbers = #tpu.dot_dimension_numbers<[1], [0], [0], [1], [0, 0, 1, 1], [], []>} : vector<8x32xf32>, vector<32x128xf32>, vector<8x128xf32> -> vector<8x128xf32>
    %24 = arith.addf %22, %23 : vector<8x128xf32>
    %cst_19 = arith.constant 5.000000e-01 : f32
    %25 = vector.broadcast %cst_19 : f32 to vector<8x128xf32>
    %26 = arith.mulf %25, %24 : vector<8x128xf32>
    %27 = math.tanh %26 : vector<8x128xf32>
    %cst_20 = arith.constant 5.000000e-01 : f32
    %28 = vector.broadcast %cst_20 : f32 to vector<8x128xf32>
    %29 = arith.mulf %28, %27 : vector<8x128xf32>
    %cst_21 = arith.constant 5.000000e-01 : f32
    %30 = vector.broadcast %cst_21 : f32 to vector<8x128xf32>
    %31 = arith.addf %29, %30 : vector<8x128xf32>
    %32 = math.tanh %24 : vector<8x128xf32>
    %33 = vector.extract_strided_slice %31 {offsets = [0, 0], sizes = [8, 32], strides = [1, 1]} : vector<8x128xf32> to vector<8x32xf32>
    %34 = vector.extract_strided_slice %31 {offsets = [0, 32], sizes = [8, 32], strides = [1, 1]} : vector<8x128xf32> to vector<8x32xf32>
    %35 = vector.extract_strided_slice %32 {offsets = [0, 64], sizes = [8, 32], strides = [1, 1]} : vector<8x128xf32> to vector<8x32xf32>
    %36 = vector.extract_strided_slice %31 {offsets = [0, 96], sizes = [8, 32], strides = [1, 1]} : vector<8x128xf32> to vector<8x32xf32>
    %37 = arith.mulf %34, %21 : vector<8x32xf32>
    %38 = arith.mulf %33, %35 : vector<8x32xf32>
    %39 = arith.addf %37, %38 : vector<8x32xf32>
    %40 = math.tanh %39 : vector<8x32xf32>
    %41 = arith.mulf %36, %40 : vector<8x32xf32>
    %42 = vector.extract_strided_slice %19 {offsets = [8, 0], sizes = [8, 128], strides = [1, 1]} : vector<72x128xf32> to vector<8x128xf32>
    %cst_22 = arith.constant dense<0.000000e+00> : vector<8x128xf32>
    %43 = tpu.matmul %41, %1, %cst_22 {dimension_numbers = #tpu.dot_dimension_numbers<[1], [0], [0], [1], [0, 0, 1, 1], [], []>} : vector<8x32xf32>, vector<32x128xf32>, vector<8x128xf32> -> vector<8x128xf32>
    %44 = arith.addf %42, %43 : vector<8x128xf32>
    %cst_23 = arith.constant 5.000000e-01 : f32
    %45 = vector.broadcast %cst_23 : f32 to vector<8x128xf32>
    %46 = arith.mulf %45, %44 : vector<8x128xf32>
    %47 = math.tanh %46 : vector<8x128xf32>
    %cst_24 = arith.constant 5.000000e-01 : f32
    %48 = vector.broadcast %cst_24 : f32 to vector<8x128xf32>
    %49 = arith.mulf %48, %47 : vector<8x128xf32>
    %cst_25 = arith.constant 5.000000e-01 : f32
    %50 = vector.broadcast %cst_25 : f32 to vector<8x128xf32>
    %51 = arith.addf %49, %50 : vector<8x128xf32>
    %52 = math.tanh %44 : vector<8x128xf32>
    %53 = vector.extract_strided_slice %51 {offsets = [0, 0], sizes = [8, 32], strides = [1, 1]} : vector<8x128xf32> to vector<8x32xf32>
    %54 = vector.extract_strided_slice %51 {offsets = [0, 32], sizes = [8, 32], strides = [1, 1]} : vector<8x128xf32> to vector<8x32xf32>
    %55 = vector.extract_strided_slice %52 {offsets = [0, 64], sizes = [8, 32], strides = [1, 1]} : vector<8x128xf32> to vector<8x32xf32>
    %56 = vector.extract_strided_slice %51 {offsets = [0, 96], sizes = [8, 32], strides = [1, 1]} : vector<8x128xf32> to vector<8x32xf32>
    %57 = arith.mulf %54, %39 : vector<8x32xf32>
    %58 = arith.mulf %53, %55 : vector<8x32xf32>
    %59 = arith.addf %57, %58 : vector<8x32xf32>
    %60 = math.tanh %59 : vector<8x32xf32>
    %61 = arith.mulf %56, %60 : vector<8x32xf32>
    %62 = vector.extract_strided_slice %19 {offsets = [16, 0], sizes = [8, 128], strides = [1, 1]} : vector<72x128xf32> to vector<8x128xf32>
    %cst_26 = arith.constant dense<0.000000e+00> : vector<8x128xf32>
    %63 = tpu.matmul %61, %1, %cst_26 {dimension_numbers = #tpu.dot_dimension_numbers<[1], [0], [0], [1], [0, 0, 1, 1], [], []>} : vector<8x32xf32>, vector<32x128xf32>, vector<8x128xf32> -> vector<8x128xf32>
    %64 = arith.addf %62, %63 : vector<8x128xf32>
    %cst_27 = arith.constant 5.000000e-01 : f32
    %65 = vector.broadcast %cst_27 : f32 to vector<8x128xf32>
    %66 = arith.mulf %65, %64 : vector<8x128xf32>
    %67 = math.tanh %66 : vector<8x128xf32>
    %cst_28 = arith.constant 5.000000e-01 : f32
    %68 = vector.broadcast %cst_28 : f32 to vector<8x128xf32>
    %69 = arith.mulf %68, %67 : vector<8x128xf32>
    %cst_29 = arith.constant 5.000000e-01 : f32
    %70 = vector.broadcast %cst_29 : f32 to vector<8x128xf32>
    %71 = arith.addf %69, %70 : vector<8x128xf32>
    %72 = math.tanh %64 : vector<8x128xf32>
    %73 = vector.extract_strided_slice %71 {offsets = [0, 0], sizes = [8, 32], strides = [1, 1]} : vector<8x128xf32> to vector<8x32xf32>
    %74 = vector.extract_strided_slice %71 {offsets = [0, 32], sizes = [8, 32], strides = [1, 1]} : vector<8x128xf32> to vector<8x32xf32>
    %75 = vector.extract_strided_slice %72 {offsets = [0, 64], sizes = [8, 32], strides = [1, 1]} : vector<8x128xf32> to vector<8x32xf32>
    %76 = vector.extract_strided_slice %71 {offsets = [0, 96], sizes = [8, 32], strides = [1, 1]} : vector<8x128xf32> to vector<8x32xf32>
    %77 = arith.mulf %74, %59 : vector<8x32xf32>
    %78 = arith.mulf %73, %75 : vector<8x32xf32>
    %79 = arith.addf %77, %78 : vector<8x32xf32>
    %80 = math.tanh %79 : vector<8x32xf32>
    %81 = arith.mulf %76, %80 : vector<8x32xf32>
    %82 = vector.extract_strided_slice %19 {offsets = [24, 0], sizes = [8, 128], strides = [1, 1]} : vector<72x128xf32> to vector<8x128xf32>
    %cst_30 = arith.constant dense<0.000000e+00> : vector<8x128xf32>
    %83 = tpu.matmul %81, %1, %cst_30 {dimension_numbers = #tpu.dot_dimension_numbers<[1], [0], [0], [1], [0, 0, 1, 1], [], []>} : vector<8x32xf32>, vector<32x128xf32>, vector<8x128xf32> -> vector<8x128xf32>
    %84 = arith.addf %82, %83 : vector<8x128xf32>
    %cst_31 = arith.constant 5.000000e-01 : f32
    %85 = vector.broadcast %cst_31 : f32 to vector<8x128xf32>
    %86 = arith.mulf %85, %84 : vector<8x128xf32>
    %87 = math.tanh %86 : vector<8x128xf32>
    %cst_32 = arith.constant 5.000000e-01 : f32
    %88 = vector.broadcast %cst_32 : f32 to vector<8x128xf32>
    %89 = arith.mulf %88, %87 : vector<8x128xf32>
    %cst_33 = arith.constant 5.000000e-01 : f32
    %90 = vector.broadcast %cst_33 : f32 to vector<8x128xf32>
    %91 = arith.addf %89, %90 : vector<8x128xf32>
    %92 = math.tanh %84 : vector<8x128xf32>
    %93 = vector.extract_strided_slice %91 {offsets = [0, 0], sizes = [8, 32], strides = [1, 1]} : vector<8x128xf32> to vector<8x32xf32>
    %94 = vector.extract_strided_slice %91 {offsets = [0, 32], sizes = [8, 32], strides = [1, 1]} : vector<8x128xf32> to vector<8x32xf32>
    %95 = vector.extract_strided_slice %92 {offsets = [0, 64], sizes = [8, 32], strides = [1, 1]} : vector<8x128xf32> to vector<8x32xf32>
    %96 = vector.extract_strided_slice %91 {offsets = [0, 96], sizes = [8, 32], strides = [1, 1]} : vector<8x128xf32> to vector<8x32xf32>
    %97 = arith.mulf %94, %79 : vector<8x32xf32>
    %98 = arith.mulf %93, %95 : vector<8x32xf32>
    %99 = arith.addf %97, %98 : vector<8x32xf32>
    %100 = math.tanh %99 : vector<8x32xf32>
    %101 = arith.mulf %96, %100 : vector<8x32xf32>
    %102 = vector.extract_strided_slice %19 {offsets = [32, 0], sizes = [8, 128], strides = [1, 1]} : vector<72x128xf32> to vector<8x128xf32>
    %cst_34 = arith.constant dense<0.000000e+00> : vector<8x128xf32>
    %103 = tpu.matmul %101, %1, %cst_34 {dimension_numbers = #tpu.dot_dimension_numbers<[1], [0], [0], [1], [0, 0, 1, 1], [], []>} : vector<8x32xf32>, vector<32x128xf32>, vector<8x128xf32> -> vector<8x128xf32>
    %104 = arith.addf %102, %103 : vector<8x128xf32>
    %cst_35 = arith.constant 5.000000e-01 : f32
    %105 = vector.broadcast %cst_35 : f32 to vector<8x128xf32>
    %106 = arith.mulf %105, %104 : vector<8x128xf32>
    %107 = math.tanh %106 : vector<8x128xf32>
    %cst_36 = arith.constant 5.000000e-01 : f32
    %108 = vector.broadcast %cst_36 : f32 to vector<8x128xf32>
    %109 = arith.mulf %108, %107 : vector<8x128xf32>
    %cst_37 = arith.constant 5.000000e-01 : f32
    %110 = vector.broadcast %cst_37 : f32 to vector<8x128xf32>
    %111 = arith.addf %109, %110 : vector<8x128xf32>
    %112 = math.tanh %104 : vector<8x128xf32>
    %113 = vector.extract_strided_slice %111 {offsets = [0, 0], sizes = [8, 32], strides = [1, 1]} : vector<8x128xf32> to vector<8x32xf32>
    %114 = vector.extract_strided_slice %111 {offsets = [0, 32], sizes = [8, 32], strides = [1, 1]} : vector<8x128xf32> to vector<8x32xf32>
    %115 = vector.extract_strided_slice %112 {offsets = [0, 64], sizes = [8, 32], strides = [1, 1]} : vector<8x128xf32> to vector<8x32xf32>
    %116 = vector.extract_strided_slice %111 {offsets = [0, 96], sizes = [8, 32], strides = [1, 1]} : vector<8x128xf32> to vector<8x32xf32>
    %117 = arith.mulf %114, %99 : vector<8x32xf32>
    %118 = arith.mulf %113, %115 : vector<8x32xf32>
    %119 = arith.addf %117, %118 : vector<8x32xf32>
    %120 = math.tanh %119 : vector<8x32xf32>
    %121 = arith.mulf %116, %120 : vector<8x32xf32>
    %122 = vector.extract_strided_slice %19 {offsets = [40, 0], sizes = [8, 128], strides = [1, 1]} : vector<72x128xf32> to vector<8x128xf32>
    %cst_38 = arith.constant dense<0.000000e+00> : vector<8x128xf32>
    %123 = tpu.matmul %121, %1, %cst_38 {dimension_numbers = #tpu.dot_dimension_numbers<[1], [0], [0], [1], [0, 0, 1, 1], [], []>} : vector<8x32xf32>, vector<32x128xf32>, vector<8x128xf32> -> vector<8x128xf32>
    %124 = arith.addf %122, %123 : vector<8x128xf32>
    %cst_39 = arith.constant 5.000000e-01 : f32
    %125 = vector.broadcast %cst_39 : f32 to vector<8x128xf32>
    %126 = arith.mulf %125, %124 : vector<8x128xf32>
    %127 = math.tanh %126 : vector<8x128xf32>
    %cst_40 = arith.constant 5.000000e-01 : f32
    %128 = vector.broadcast %cst_40 : f32 to vector<8x128xf32>
    %129 = arith.mulf %128, %127 : vector<8x128xf32>
    %cst_41 = arith.constant 5.000000e-01 : f32
    %130 = vector.broadcast %cst_41 : f32 to vector<8x128xf32>
    %131 = arith.addf %129, %130 : vector<8x128xf32>
    %132 = math.tanh %124 : vector<8x128xf32>
    %133 = vector.extract_strided_slice %131 {offsets = [0, 0], sizes = [8, 32], strides = [1, 1]} : vector<8x128xf32> to vector<8x32xf32>
    %134 = vector.extract_strided_slice %131 {offsets = [0, 32], sizes = [8, 32], strides = [1, 1]} : vector<8x128xf32> to vector<8x32xf32>
    %135 = vector.extract_strided_slice %132 {offsets = [0, 64], sizes = [8, 32], strides = [1, 1]} : vector<8x128xf32> to vector<8x32xf32>
    %136 = vector.extract_strided_slice %131 {offsets = [0, 96], sizes = [8, 32], strides = [1, 1]} : vector<8x128xf32> to vector<8x32xf32>
    %137 = arith.mulf %134, %119 : vector<8x32xf32>
    %138 = arith.mulf %133, %135 : vector<8x32xf32>
    %139 = arith.addf %137, %138 : vector<8x32xf32>
    %140 = math.tanh %139 : vector<8x32xf32>
    %141 = arith.mulf %136, %140 : vector<8x32xf32>
    %142 = vector.extract_strided_slice %19 {offsets = [48, 0], sizes = [8, 128], strides = [1, 1]} : vector<72x128xf32> to vector<8x128xf32>
    %cst_42 = arith.constant dense<0.000000e+00> : vector<8x128xf32>
    %143 = tpu.matmul %141, %1, %cst_42 {dimension_numbers = #tpu.dot_dimension_numbers<[1], [0], [0], [1], [0, 0, 1, 1], [], []>} : vector<8x32xf32>, vector<32x128xf32>, vector<8x128xf32> -> vector<8x128xf32>
    %144 = arith.addf %142, %143 : vector<8x128xf32>
    %cst_43 = arith.constant 5.000000e-01 : f32
    %145 = vector.broadcast %cst_43 : f32 to vector<8x128xf32>
    %146 = arith.mulf %145, %144 : vector<8x128xf32>
    %147 = math.tanh %146 : vector<8x128xf32>
    %cst_44 = arith.constant 5.000000e-01 : f32
    %148 = vector.broadcast %cst_44 : f32 to vector<8x128xf32>
    %149 = arith.mulf %148, %147 : vector<8x128xf32>
    %cst_45 = arith.constant 5.000000e-01 : f32
    %150 = vector.broadcast %cst_45 : f32 to vector<8x128xf32>
    %151 = arith.addf %149, %150 : vector<8x128xf32>
    %152 = math.tanh %144 : vector<8x128xf32>
    %153 = vector.extract_strided_slice %151 {offsets = [0, 0], sizes = [8, 32], strides = [1, 1]} : vector<8x128xf32> to vector<8x32xf32>
    %154 = vector.extract_strided_slice %151 {offsets = [0, 32], sizes = [8, 32], strides = [1, 1]} : vector<8x128xf32> to vector<8x32xf32>
    %155 = vector.extract_strided_slice %152 {offsets = [0, 64], sizes = [8, 32], strides = [1, 1]} : vector<8x128xf32> to vector<8x32xf32>
    %156 = vector.extract_strided_slice %151 {offsets = [0, 96], sizes = [8, 32], strides = [1, 1]} : vector<8x128xf32> to vector<8x32xf32>
    %157 = arith.mulf %154, %139 : vector<8x32xf32>
    %158 = arith.mulf %153, %155 : vector<8x32xf32>
    %159 = arith.addf %157, %158 : vector<8x32xf32>
    %160 = math.tanh %159 : vector<8x32xf32>
    %161 = arith.mulf %156, %160 : vector<8x32xf32>
    %162 = vector.extract_strided_slice %19 {offsets = [56, 0], sizes = [8, 128], strides = [1, 1]} : vector<72x128xf32> to vector<8x128xf32>
    %cst_46 = arith.constant dense<0.000000e+00> : vector<8x128xf32>
    %163 = tpu.matmul %161, %1, %cst_46 {dimension_numbers = #tpu.dot_dimension_numbers<[1], [0], [0], [1], [0, 0, 1, 1], [], []>} : vector<8x32xf32>, vector<32x128xf32>, vector<8x128xf32> -> vector<8x128xf32>
    %164 = arith.addf %162, %163 : vector<8x128xf32>
    %cst_47 = arith.constant 5.000000e-01 : f32
    %165 = vector.broadcast %cst_47 : f32 to vector<8x128xf32>
    %166 = arith.mulf %165, %164 : vector<8x128xf32>
    %167 = math.tanh %166 : vector<8x128xf32>
    %cst_48 = arith.constant 5.000000e-01 : f32
    %168 = vector.broadcast %cst_48 : f32 to vector<8x128xf32>
    %169 = arith.mulf %168, %167 : vector<8x128xf32>
    %cst_49 = arith.constant 5.000000e-01 : f32
    %170 = vector.broadcast %cst_49 : f32 to vector<8x128xf32>
    %171 = arith.addf %169, %170 : vector<8x128xf32>
    %172 = math.tanh %164 : vector<8x128xf32>
    %173 = vector.extract_strided_slice %171 {offsets = [0, 0], sizes = [8, 32], strides = [1, 1]} : vector<8x128xf32> to vector<8x32xf32>
    %174 = vector.extract_strided_slice %171 {offsets = [0, 32], sizes = [8, 32], strides = [1, 1]} : vector<8x128xf32> to vector<8x32xf32>
    %175 = vector.extract_strided_slice %172 {offsets = [0, 64], sizes = [8, 32], strides = [1, 1]} : vector<8x128xf32> to vector<8x32xf32>
    %176 = vector.extract_strided_slice %171 {offsets = [0, 96], sizes = [8, 32], strides = [1, 1]} : vector<8x128xf32> to vector<8x32xf32>
    %177 = arith.mulf %174, %159 : vector<8x32xf32>
    %178 = arith.mulf %173, %175 : vector<8x32xf32>
    %179 = arith.addf %177, %178 : vector<8x32xf32>
    %180 = math.tanh %179 : vector<8x32xf32>
    %181 = arith.mulf %176, %180 : vector<8x32xf32>
    %182 = vector.extract_strided_slice %19 {offsets = [64, 0], sizes = [8, 128], strides = [1, 1]} : vector<72x128xf32> to vector<8x128xf32>
    %cst_50 = arith.constant dense<0.000000e+00> : vector<8x128xf32>
    %183 = tpu.matmul %181, %1, %cst_50 {dimension_numbers = #tpu.dot_dimension_numbers<[1], [0], [0], [1], [0, 0, 1, 1], [], []>} : vector<8x32xf32>, vector<32x128xf32>, vector<8x128xf32> -> vector<8x128xf32>
    %184 = arith.addf %182, %183 : vector<8x128xf32>
    %cst_51 = arith.constant 5.000000e-01 : f32
    %185 = vector.broadcast %cst_51 : f32 to vector<8x128xf32>
    %186 = arith.mulf %185, %184 : vector<8x128xf32>
    %187 = math.tanh %186 : vector<8x128xf32>
    %cst_52 = arith.constant 5.000000e-01 : f32
    %188 = vector.broadcast %cst_52 : f32 to vector<8x128xf32>
    %189 = arith.mulf %188, %187 : vector<8x128xf32>
    %cst_53 = arith.constant 5.000000e-01 : f32
    %190 = vector.broadcast %cst_53 : f32 to vector<8x128xf32>
    %191 = arith.addf %189, %190 : vector<8x128xf32>
    %192 = math.tanh %184 : vector<8x128xf32>
    %193 = vector.extract_strided_slice %191 {offsets = [0, 0], sizes = [8, 32], strides = [1, 1]} : vector<8x128xf32> to vector<8x32xf32>
    %194 = vector.extract_strided_slice %191 {offsets = [0, 32], sizes = [8, 32], strides = [1, 1]} : vector<8x128xf32> to vector<8x32xf32>
    %195 = vector.extract_strided_slice %192 {offsets = [0, 64], sizes = [8, 32], strides = [1, 1]} : vector<8x128xf32> to vector<8x32xf32>
    %196 = vector.extract_strided_slice %191 {offsets = [0, 96], sizes = [8, 32], strides = [1, 1]} : vector<8x128xf32> to vector<8x32xf32>
    %197 = arith.mulf %194, %179 : vector<8x32xf32>
    %198 = arith.mulf %193, %195 : vector<8x32xf32>
    %199 = arith.addf %197, %198 : vector<8x32xf32>
    %200 = math.tanh %199 : vector<8x32xf32>
    %201 = arith.mulf %196, %200 : vector<8x32xf32>
    %cst_54 = arith.constant dense<0.000000e+00> : vector<8x32xf32>
    %202 = tpu.matmul %201, %6, %cst_54 {dimension_numbers = #tpu.dot_dimension_numbers<[1], [0], [0], [1], [0, 0, 1, 1], [], []>} : vector<8x32xf32>, vector<32x32xf32>, vector<8x32xf32> -> vector<8x32xf32>
    %203 = vector.broadcast %8 : vector<1x32xf32> to vector<8x32xf32>
    %204 = arith.addf %202, %203 : vector<8x32xf32>
    %cst_55 = arith.constant 0.000000e+00 : f32
    %205 = vector.broadcast %cst_55 : f32 to vector<8x32xf32>
    %206 = arith.maximumf %204, %205 : vector<8x32xf32>
    %cst_56 = arith.constant dense<0.000000e+00> : vector<8x128xf32>
    %207 = tpu.matmul %206, %2, %cst_56 {dimension_numbers = #tpu.dot_dimension_numbers<[1], [0], [0], [1], [0, 0, 1, 1], [], []>} : vector<8x32xf32>, vector<32x128xf32>, vector<8x128xf32> -> vector<8x128xf32>
    %208 = vector.broadcast %4 : vector<1x128xf32> to vector<8x128xf32>
    %209 = arith.addf %207, %208 : vector<8x128xf32>
    %c0_57 = arith.constant 0 : index
    %c0_58 = arith.constant 0 : index
    %210 = vector.load %arg4[%c0_57, %c0_58] : memref<8x128xf32, #tpu.memory_space<vmem>>, vector<8x128xf32>
    tpu.vector_store %arg4[%c0_57, %c0_58], %209 {strides = array<i32>} : memref<8x128xf32, #tpu.memory_space<vmem>>, vector<8x128xf32>,
    return
  }
}

</mosaic_0001>

<bundles_post_ra>
// kernel: squeeze.1
= control target key start
LH: loop header
LB: loop body
LE: loop exit
PB: predicated region body
PF: predicated region fallthrough
CT: control target
= control target key end

     0   :  { %vm7_vm0 = vcmask 15360   ;;  %s30_s8 = smov 124   ;;  %s47_s0 = inlined_call_operand.vmem [shape: f32[6], index: 0, kind: input, shape index: {}]   ;;  %s48_s1 = inlined_call_operand.vmem [shape: f32[3,2], index: 1, kind: output, shape index: {}]  }
   0x1   :  { %v4_v0 = vld [vmem:[%s47_s0] sm:$0x1]  ;;  %s29_s0 = smov 126  }
   0x2   :  { %5 = vst [vmem:[#allocation1] sm:$0x1] %v4_v0 }
   0x9   :  { %v9_v1 = vld [vmem:[#allocation1] sm:$0x1]  }
   0xa   :  { %v6_v2 = vld [vmem:[#allocation1] sm:$0x1]   ;;  %10 = vrot.lane.b32.xlu0 %v9_v1, %s29_s0 }
   0xb   :  { %8 = vst.msk [vmem:[#allocation0] sm:$0x1] %vm7_vm0, %v6_v2   ;;  %v15_v3 = vld [vmem:[#allocation1] sm:$0x1]  }
   0xe   :  { %16 = vrot.lane.b32.xlu0 %v15_v3, %s30_s8 }
  0x7c   :  { %v11_v4 = vpop.permute.xlu0 %10  }
  0x7d   :  { %14 = vst.msk [vmem:[#allocation0 + $0x1] sm:$0x1] %vm7_vm0, %v11_v4  }
  0x80   :  { %v17_v5 = vpop.permute.xlu0 %16  }
  0x81   :  { %20 = vst.msk [vmem:[#allocation0 + $0x2] sm:$0x1] %vm7_vm0, %v17_v5  }
  0x88   :  { %v24_v6 = vld [vmem:[#allocation0] sm:$0xf] }
  0x89   :  { %26 = vst [vmem:[%s48_s1] sm:$0xf] %v24_v6 }

// kernel: listener_forward.1
= control target key start
LH: loop header
LB: loop body
LE: loop exit
PB: predicated region body
PF: predicated region fallthrough
CT: control target
= control target key end

     0   :  { %v1722_v0 = vmov 0.0|0.0   ;;  %vm1723_vm0 = vmmov 0   ;;  %v1724_v3 = vmov 0.0   ;;  %vm44_vm1 = vcmask 130048   ;;  %s1726_s29 = smov 32   ;;  %s2014_s3 = inlined_call_operand.vmem [shape: f32[64,32], index: 3, kind: input, shape index: {}]   ;;  %s2015_s2 = inlined_call_operand.vmem [shape: f32[112,128], index: 2, kind: input, shape index: {}]   ;;  %s2016_s0 = inlined_call_operand.vmem [shape: f32[8,16], index: 0, kind: input, shape index: {}]   ;;  %s2017_s1 = inlined_call_operand.vmem [shape: f32[64,32], index: 1, kind: input, shape index: {}]   ;;  %s2018_s4 = inlined_call_operand.vmem [shape: f32[8,128], index: 4, kind: output, shape index: {}]  }
   0x1   :  { %1569 = vmatprep.subr.bf16.mxu0 %v1722_v0  ;;  %v31_v1 = vld [vmem:[%s2014_s3] sm:$0xff]  ;;  %v32_v2 = vld [vmem:[%s2014_s3 + $0x8] sm:$0xff]  ;;  %1410 = vmatprep.mubr.msk.f32.mxu0 %vm1723_vm0, %v1724_v3  ;;  %v19_v9 = vld [vmem:[%s2015_s2 + $0x10] sm:$0xff]  ;;  %vm131_vm2 = vcmask 261120  }
   0x2   :  { %v1570_v4 = vpack.c.bf16 %v32_v2, %v31_v1  ;;  %v17_v5 = vld [vmem:[%s2015_s2] sm:$0xff]  ;;  %v18_v6 = vld [vmem:[%s2015_s2 + $0x8] sm:$0xff]  ;;  %1584 = vmatprep.subr.bf16.mxu1 %v1722_v0  ;;  %1467 = vmatprep.mubr.msk.f32.mxu1 %vm1723_vm0, %v1724_v3  ;;  %v20_v10 = vld [vmem:[%s2015_s2 + $0x18] sm:$0xff] }
   0x3   :  { %v39_v7 = vld [vmem:[%s2016_s0] sm:$0xff]  ;;  %v1573_v8 = vpack.c.bf16 %v18_v6, %v17_v5  ;;  %v1576_v11 = vpack.c.bf16 %v20_v10, %v19_v9  ;;  %v22_v13 = vld [vmem:[%s2015_s2 + $0x28] sm:$0xff]  ;;  %v23_v15 = vld [vmem:[%s2015_s2 + $0x30] sm:$0xff] }
   0x4   :  { %1571 = vmatpush3.bf16.msra.mxu0 %v1570_v4  ;;  %v21_v12 = vld [vmem:[%s2015_s2 + $0x20] sm:$0xff]  ;;  %v24_v16 = vld [vmem:[%s2015_s2 + $0x38] sm:$0xff]  ;;  %v1311_v18 = vld [vmem:[%s2014_s3 + $0x30] ss:$0 sm:$0xff] }
   0x5   :  { %1572 = vmatprep.subr.bf16.mxu0 %v1722_v0  ;;  %v1790_v14 = vpack.c.bf16 %v22_v13, %v21_v12  ;;  %v1800_v17 = vpack.c.bf16 %v24_v16, %v23_v15  ;;  %v119_v23 = vld [vmem:[%s2017_s1] sm:$0xff]  ;;  %v120_v24 = vld [vmem:[%s2017_s1 + $0x8] sm:$0xff]  ;;  %v121_v25 = vld [vmem:[%s2017_s1 + $0x10] sm:$0xff] }
   0x6   :  { %v122_v26 = vld [vmem:[%s2017_s1 + $0x18] sm:$0xff]  ;;  %v123_v27 = vld [vmem:[%s2017_s1 + $0x20] sm:$0xff]  ;;  %v124_v28 = vld [vmem:[%s2017_s1 + $0x28] sm:$0xff] }
   0x7   :  { %1411 = vmatmul.mubr.msk.f32.vlgmr.msra.gmra.mrb[0].mxu0 %vm44_vm1, %v39_v7  ;;  %1586 = vmatpush3.bf16.msra.mxu1 %v1790_v14  ;;  %v125_v29 = vld [vmem:[%s2017_s1 + $0x30] sm:$0xff]  ;;  %v126_v30 = vld [vmem:[%s2017_s1 + $0x38] sm:$0xff]  ;;  %v1313_v31 = vld [vmem:[%s2015_s2 + $0x60] ss:$0 sm:$0xff]  ;;  %s1725_s1 = smov 64  }
   0x8   :  { %1574 = vmatpush3.bf16.msra.mxu0 %v1573_v8  ;;  %1421 = vmatprep.mubr.msk.f32.mxu0 %vm1723_vm0, %v1724_v3 }
   0x9   :  { %1575 = vmatprep.subr.bf16.mxu0 %v1722_v0  ;;  %1587 = vmatprep.subr.bf16.mxu1 %v1722_v0 }
   0xb   :  { %1589 = vmatpush3.bf16.msra.mxu1 %v1800_v17 }
   0xc   :  { %1577 = vmatpush3.bf16.msra.mxu0 %v1576_v11  ;;  %1590 = vmatprep.subr.bf16.mxu1 %v1722_v0 }
   0xd   :  { %1578 = vmatprep.subr.bf16.mxu0 %v1722_v0 }
  0xda   :  { %v114_v19 = vpop.f32.mrb[0].mxu0 }
  0xdb   :  { %v115_v20 = vadd.f32 %v1311_v18, %v114_v19  ;;  %v1412_v21 = vpop.f32.mrb[1].mxu0 }
  0xdd   :  { %v118_v22 = vmax.f32 %v115_v20, 0.0 }
  0xdf   :  { %1422 = vmatmul.mubr.msk.f32.vlgmr.msra.gmra.mrb[2].mxu0 %vm131_vm2, %v118_v22 }
  0xe0   :  { %1580 = vmatpush3.bf16.msra.mxu0 %v1790_v14  ;;  %1424 = vmatprep.mubr.msk.f32.mxu0 %vm1723_vm0, %v1724_v3 }
  0xe1   :  { %1581 = vmatprep.subr.bf16.mxu0 %v1722_v0 }
  0xe3   :  { %1425 = vmatmul.mubr.msk.f32.gmra.mrb[4].mxu0 %vm131_vm2, %v119_v23 }
  0xe4   :  { %1427 = vmatprep.mubr.msk.f32.mxu0 %vm1723_vm0, %v1724_v3  ;;  %1583 = vmatpush3.bf16.msra.mxu0 %v1800_v17 }
  0xe5   :  { %1632 = vmatprep.subr.bf16.mxu0 %v1722_v0 }
  0xe7   :  { %1428 = vmatmul.mubr.msk.f32.gmra.mrb[6].mxu0 %vm131_vm2, %v120_v24 }
  0xe8   :  { %1430 = vmatprep.mubr.msk.f32.mxu0 %vm1723_vm0, %v1724_v3 }
  0xeb   :  { %1431 = vmatmul.mubr.msk.f32.gmra.mrb[8].mxu0 %vm131_vm2, %v121_v25 }
  0xec   :  { %1433 = vmatprep.mubr.msk.f32.mxu0 %vm1723_vm0, %v1724_v3 }
  0xef   :  { %1434 = vmatmul.mubr.msk.f32.gmra.mrb[10].mxu0 %vm131_vm2, %v122_v26 }
  0xf0   :  { %1436 = vmatprep.mubr.msk.f32.mxu0 %vm1723_vm0, %v1724_v3 }
  0xf3   :  { %1437 = vmatmul.mubr.msk.f32.gmra.mrb[12].mxu0 %vm131_vm2, %v123_v27 }
  0xf4   :  { %1439 = vmatprep.mubr.msk.f32.mxu0 %vm1723_vm0, %v1724_v3 }
  0xf7   :  { %1440 = vmatmul.mubr.msk.f32.gmra.mrb[14].mxu0 %vm131_vm2, %v124_v28 }
  0xf8   :  { %1442 = vmatprep.mubr.msk.f32.mxu0 %vm1723_vm0, %v1724_v3 }
  0xfb   :  { %1443 = vmatmul.mubr.msk.f32.gmra.mrb[16].mxu0 %vm131_vm2, %v125_v29 }
  0xfc   :  { %1445 = vmatprep.mubr.msk.f32.mxu0 %vm1723_vm0, %v1724_v3 }
  0xff   :  { %1446 = vmatmul.mubr.msk.f32.gmra.mrb[18].mxu0 %vm131_vm2, %v126_v30 }
 0x100   :  { %1456 = vmatprep.mubr.msk.f32.mxu0 %vm1723_vm0, %v1724_v3 }
 0x103   :  { %1457 = vmatmul.mubr.f32.vlgmr.msra.gmra.mrb[2].mxu0 %v1724_v3 }
 0x104   :  { %1555 = vmatprep.mubr.msk.f32.mxu0 %vm1723_vm0, %v1724_v3 }
 0x1b6   :  { %v230_v32 = vpop.f32.mrb[4].mxu0 }
 0x1b7   :  { %v231_v33 = vadd.f32 %v1313_v31, %v230_v32  ;;  %v1426_v34 = vpop.f32.mrb[5].mxu0 }
 0x1ba   :  { %v235_v35 = vpop.f32.mrb[6].mxu0 }
 0x1bb   :  { %v1868_v36 = vadd.f32 %v1313_v31, %v235_v35  ;;  %v1429_v37 = vpop.f32.mrb[7].mxu0 }
 0x1be   :  { %v240_v38 = vpop.f32.mrb[8].mxu0 }
 0x1bf   :  { %v1870_v39 = vadd.f32 %v1313_v31, %v240_v38  ;;  %v1432_v40 = vpop.f32.mrb[9].mxu0 }
 0x1c2   :  { %v245_v41 = vpop.f32.mrb[10].mxu0 }
 0x1c3   :  { %v1872_v42 = vadd.f32 %v1313_v31, %v245_v41  ;;  %v1435_v43 = vpop.f32.mrb[11].mxu0 }
 0x1c6   :  { %v250_v44 = vpop.f32.mrb[12].mxu0 }
 0x1c7   :  { %v1874_v45 = vadd.f32 %v1313_v31, %v250_v44  ;;  %v1438_v46 = vpop.f32.mrb[13].mxu0 }
 0x1ca   :  { %v255_v47 = vpop.f32.mrb[14].mxu0 }
 0x1cb   :  { %v1876_v48 = vadd.f32 %v1313_v31, %v255_v47  ;;  %v1441_v49 = vpop.f32.mrb[15].mxu0 }
 0x1ce   :  { %v260_v50 = vpop.f32.mrb[16].mxu0 }
 0x1cf   :  { %v1878_v51 = vadd.f32 %v1313_v31, %v260_v50  ;;  %v1444_v52 = vpop.f32.mrb[17].mxu0 }
 0x1d2   :  { %v265_v53 = vpop.f32.mrb[18].mxu0 }
 0x1d3   :  { %v1880_v54 = vadd.f32 %v1313_v31, %v265_v53  ;;  %v1447_v55 = vpop.f32.mrb[19].mxu0 }
 0x1d6   :  { %v338_v56 = vpop.f32.mrb[2].mxu0 }
 0x1d7   :  { %v1644_v57 = vadd.f32 %v1313_v31, %v338_v56  ;;  %v1458_v58 = vpop.f32.mrb[3].mxu0 }
 0x1d9   :  { %1668 = vtanh.f32 %v1644_v57  ;;  %v343_v60 = vmul.f32 0.5, %v1644_v57 }
 0x1db   :  { %1670 = vtanh.f32 %v343_v60 }
 0x1e3   :  { %v1669_v59 = vpop.eup %1668 }
 0x1e4   :  { %350 = vrot.lane.b32.xlu0 %v1669_v59, %s1725_s1 }
 0x1e5   :  { %v1671_v61 = vpop.eup %1670 }
 0x1e6   :  { %v345_v62 = vmul.f32 0.5, %v1671_v61 }
 0x1e8   :  { %v346_v63 = vadd.f32 0.5, %v345_v62 }
 0x1ea   :  { %v348_v4 = vmul.f32 0.0, %v346_v63 }
 0x256   :  { %v351_v1 = vpop.permute.xlu0 %350 }
 0x257   :  { %v353_v2 = vmul.f32 %v351_v1, %v346_v63 }
 0x259   :  { %355 = vrot.lane.b32.xlu0 %v353_v2, %s1726_s29 }
 0x2cb   :  { %v356_v5 = vpop.permute.xlu0 %355 }
 0x2cc   :  { %v358_v6 = vadd.f32 %v356_v5, %v348_v4 }
 0x2ce   :  { %1672 = vtanh.f32 %v358_v6 }
 0x2d8   :  { %v1673_v7 = vpop.eup %1672 }
 0x2d9   :  { %361 = vrot.lane.b32.xlu1 %v1673_v7, %s1725_s1 }
 0x34b   :  { %v362_v8 = vpop.permute.xlu1 %361 }
 0x34c   :  { %v364_v9 = vmul.f32 %v362_v8, %v346_v63 }
 0x34e   :  { %366 = vrot.lane.b32.xlu1 %v364_v9, %s1726_s29 }
 0x3c0   :  { %v367_v10 = vpop.permute.xlu1 %366 }
 0x3c1   :  { %1468 = vmatmul.mubr.msk.f32.vlgmr.msra.gmra.mrb[0].mxu1 %vm131_vm2, %v367_v10 }
 0x3c2   :  { %1592 = vmatpush3.bf16.msra.mxu1 %v1790_v14  ;;  %1478 = vmatprep.mubr.msk.f32.mxu1 %vm1723_vm0, %v1724_v3 }
 0x3c3   :  { %1593 = vmatprep.subr.bf16.mxu1 %v1722_v0 }
 0x3c6   :  { %1595 = vmatpush3.bf16.msra.mxu1 %v1800_v17 }
 0x3c7   :  { %1596 = vmatprep.subr.bf16.mxu1 %v1722_v0 }
 0x494   :  { %v436_v11 = vpop.f32.mrb[0].mxu1 }
 0x495   :  { %v440_v12 = vadd.f32 %v436_v11, %v231_v33  ;;  %v1469_v13 = vpop.f32.mrb[1].mxu1 }
 0x497   :  { %1674 = vtanh.f32 %v440_v12  ;;  %v441_v16 = vmul.f32 0.5, %v440_v12 }
 0x499   :  { %1676 = vtanh.f32 %v441_v16 }
 0x4a1   :  { %v1675_v15 = vpop.eup %1674 }
 0x4a2   :  { %448 = vrot.lane.b32.xlu0 %v1675_v15, %s1725_s1 }
 0x4a3   :  { %v1677_v18 = vpop.eup %1676 }
 0x4a4   :  { %v443_v19 = vmul.f32 0.5, %v1677_v18 }
 0x4a6   :  { %v444_v20 = vadd.f32 0.5, %v443_v19 }
 0x4a8   :  { %v446_v23 = vmul.f32 %v444_v20, %v358_v6 }
 0x514   :  { %v449_v21 = vpop.permute.xlu0 %448 }
 0x515   :  { %v451_v22 = vmul.f32 %v449_v21, %v444_v20 }
 0x517   :  { %453 = vrot.lane.b32.xlu1 %v451_v22, %s1726_s29 }
 0x589   :  { %v454_v24 = vpop.permute.xlu1 %453 }
 0x58a   :  { %v456_v25 = vadd.f32 %v454_v24, %v446_v23 }
 0x58c   :  { %1678 = vtanh.f32 %v456_v25 }
 0x596   :  { %v1679_v26 = vpop.eup %1678 }
 0x597   :  { %459 = vrot.lane.b32.xlu0 %v1679_v26, %s1725_s1 }
 0x609   :  { %v460_v27 = vpop.permute.xlu0 %459 }
 0x60a   :  { %v462_v28 = vmul.f32 %v460_v27, %v444_v20 }
 0x60c   :  { %464 = vrot.lane.b32.xlu1 %v462_v28, %s1726_s29 }
 0x67e   :  { %v465_v29 = vpop.permute.xlu1 %464 }
 0x67f   :  { %1479 = vmatmul.mubr.msk.f32.vlgmr.msra.gmra.mrb[2].mxu1 %vm131_vm2, %v465_v29 }
 0x680   :  { %1598 = vmatpush3.bf16.msra.mxu1 %v1790_v14  ;;  %1489 = vmatprep.mubr.msk.f32.mxu1 %vm1723_vm0, %v1724_v3 }
 0x681   :  { %1599 = vmatprep.subr.bf16.mxu1 %v1722_v0 }
 0x684   :  { %1601 = vmatpush3.bf16.msra.mxu1 %v1800_v17 }
 0x685   :  { %1602 = vmatprep.subr.bf16.mxu1 %v1722_v0 }
 0x752   :  { %v534_v30 = vpop.f32.mrb[2].mxu1 }
 0x753   :  { %v538_v31 = vadd.f32 %v534_v30, %v1868_v36  ;;  %v1480_v32 = vpop.f32.mrb[3].mxu1 }
 0x755   :  { %1680 = vtanh.f32 %v538_v31  ;;  %v539_v34 = vmul.f32 0.5, %v538_v31 }
 0x757   :  { %1682 = vtanh.f32 %v539_v34 }
 0x75f   :  { %v1681_v33 = vpop.eup %1680 }
 0x760   :  { %546 = vrot.lane.b32.xlu0 %v1681_v33, %s1725_s1 }
 0x761   :  { %v1683_v35 = vpop.eup %1682 }
 0x762   :  { %v541_v37 = vmul.f32 0.5, %v1683_v35 }
 0x764   :  { %v542_v38 = vadd.f32 0.5, %v541_v37 }
 0x766   :  { %v544_v43 = vmul.f32 %v542_v38, %v456_v25 }
 0x7d2   :  { %v547_v40 = vpop.permute.xlu0 %546 }
 0x7d3   :  { %v549_v41 = vmul.f32 %v547_v40, %v542_v38 }
 0x7d5   :  { %551 = vrot.lane.b32.xlu1 %v549_v41, %s1726_s29 }
 0x847   :  { %v552_v44 = vpop.permute.xlu1 %551 }
 0x848   :  { %v554_v46 = vadd.f32 %v552_v44, %v544_v43 }
 0x84a   :  { %1684 = vtanh.f32 %v554_v46 }
 0x854   :  { %v1685_v47 = vpop.eup %1684 }
 0x855   :  { %557 = vrot.lane.b32.xlu0 %v1685_v47, %s1725_s1 }
 0x8c7   :  { %v558_v36 = vpop.permute.xlu0 %557 }
 0x8c8   :  { %v560_v49 = vmul.f32 %v558_v36, %v542_v38 }
 0x8ca   :  { %562 = vrot.lane.b32.xlu1 %v560_v49, %s1726_s29 }
 0x93c   :  { %v563_v50 = vpop.permute.xlu1 %562 }
 0x93d   :  { %1490 = vmatmul.mubr.msk.f32.vlgmr.msra.gmra.mrb[4].mxu1 %vm131_vm2, %v563_v50 }
 0x93e   :  { %1604 = vmatpush3.bf16.msra.mxu1 %v1790_v14  ;;  %1500 = vmatprep.mubr.msk.f32.mxu1 %vm1723_vm0, %v1724_v3 }
 0x93f   :  { %1605 = vmatprep.subr.bf16.mxu1 %v1722_v0 }
 0x942   :  { %1607 = vmatpush3.bf16.msra.mxu1 %v1800_v17 }
 0x943   :  { %1608 = vmatprep.subr.bf16.mxu1 %v1722_v0 }
 0xa10   :  { %v632_v52 = vpop.f32.mrb[4].mxu1 }
 0xa11   :  { %v636_v53 = vadd.f32 %v632_v52, %v1870_v39  ;;  %v1491_v55 = vpop.f32.mrb[5].mxu1 }
 0xa13   :  { %1686 = vtanh.f32 %v636_v53  ;;  %v637_v57 = vmul.f32 0.5, %v636_v53 }
 0xa15   :  { %1688 = vtanh.f32 %v637_v57 }
 0xa1d   :  { %v1687_v56 = vpop.eup %1686 }
 0xa1e   :  { %644 = vrot.lane.b32.xlu0 %v1687_v56, %s1725_s1 }
 0xa1f   :  { %v1689_v58 = vpop.eup %1688 }
 0xa20   :  { %v639_v59 = vmul.f32 0.5, %v1689_v58 }
 0xa22   :  { %v640_v60 = vadd.f32 0.5, %v639_v59 }
 0xa24   :  { %v642_v63 = vmul.f32 %v640_v60, %v554_v46 }
 0xa90   :  { %v645_v61 = vpop.permute.xlu0 %644 }
 0xa91   :  { %v647_v62 = vmul.f32 %v645_v61, %v640_v60 }
 0xa93   :  { %649 = vrot.lane.b32.xlu1 %v647_v62, %s1726_s29 }
 0xb05   :  { %v650_v1 = vpop.permute.xlu1 %649 }
 0xb06   :  { %v652_v2 = vadd.f32 %v650_v1, %v642_v63 }
 0xb08   :  { %1690 = vtanh.f32 %v652_v2 }
 0xb12   :  { %v1691_v4 = vpop.eup %1690 }
 0xb13   :  { %655 = vrot.lane.b32.xlu0 %v1691_v4, %s1725_s1 }
 0xb85   :  { %v656_v39 = vpop.permute.xlu0 %655 }
 0xb86   :  { %v658_v5 = vmul.f32 %v656_v39, %v640_v60 }
 0xb88   :  { %660 = vrot.lane.b32.xlu1 %v658_v5, %s1726_s29 }
 0xbfa   :  { %v661_v6 = vpop.permute.xlu1 %660 }
 0xbfb   :  { %1501 = vmatmul.mubr.msk.f32.vlgmr.msra.gmra.mrb[6].mxu1 %vm131_vm2, %v661_v6 }
 0xbfc   :  { %1610 = vmatpush3.bf16.msra.mxu1 %v1790_v14  ;;  %1511 = vmatprep.mubr.msk.f32.mxu1 %vm1723_vm0, %v1724_v3 }
 0xbfd   :  { %1611 = vmatprep.subr.bf16.mxu1 %v1722_v0 }
 0xc00   :  { %1613 = vmatpush3.bf16.msra.mxu1 %v1800_v17 }
 0xc01   :  { %1614 = vmatprep.subr.bf16.mxu1 %v1722_v0 }
 0xcce   :  { %v730_v7 = vpop.f32.mrb[6].mxu1 }
 0xccf   :  { %v734_v8 = vadd.f32 %v730_v7, %v1872_v42  ;;  %v1502_v9 = vpop.f32.mrb[7].mxu1 }
 0xcd1   :  { %1692 = vtanh.f32 %v734_v8  ;;  %v735_v11 = vmul.f32 0.5, %v734_v8 }
 0xcd3   :  { %1694 = vtanh.f32 %v735_v11 }
 0xcdb   :  { %v1693_v10 = vpop.eup %1692 }
 0xcdc   :  { %742 = vrot.lane.b32.xlu0 %v1693_v10, %s1725_s1 }
 0xcdd   :  { %v1695_v12 = vpop.eup %1694 }
 0xcde   :  { %v737_v13 = vmul.f32 0.5, %v1695_v12 }
 0xce0   :  { %v738_v15 = vadd.f32 0.5, %v737_v13 }
 0xce2   :  { %v740_v19 = vmul.f32 %v738_v15, %v652_v2 }
 0xd4e   :  { %v743_v16 = vpop.permute.xlu0 %742 }
 0xd4f   :  { %v745_v18 = vmul.f32 %v743_v16, %v738_v15 }
 0xd51   :  { %747 = vrot.lane.b32.xlu1 %v745_v18, %s1726_s29 }
 0xdc3   :  { %v748_v20 = vpop.permute.xlu1 %747 }
 0xdc4   :  { %v750_v21 = vadd.f32 %v748_v20, %v740_v19 }
 0xdc6   :  { %1696 = vtanh.f32 %v750_v21 }
 0xdd0   :  { %v1697_v22 = vpop.eup %1696 }
 0xdd1   :  { %753 = vrot.lane.b32.xlu0 %v1697_v22, %s1725_s1 }
 0xe43   :  { %v754_v42 = vpop.permute.xlu0 %753 }
 0xe44   :  { %v756_v23 = vmul.f32 %v754_v42, %v738_v15 }
 0xe46   :  { %758 = vrot.lane.b32.xlu1 %v756_v23, %s1726_s29 }
 0xeb8   :  { %v759_v24 = vpop.permute.xlu1 %758 }
 0xeb9   :  { %1512 = vmatmul.mubr.msk.f32.vlgmr.msra.gmra.mrb[8].mxu1 %vm131_vm2, %v759_v24 }
 0xeba   :  { %1616 = vmatpush3.bf16.msra.mxu1 %v1790_v14  ;;  %1522 = vmatprep.mubr.msk.f32.mxu1 %vm1723_vm0, %v1724_v3 }
 0xebb   :  { %1617 = vmatprep.subr.bf16.mxu1 %v1722_v0 }
 0xebe   :  { %1619 = vmatpush3.bf16.msra.mxu1 %v1800_v17 }
 0xebf   :  { %1620 = vmatprep.subr.bf16.mxu1 %v1722_v0 }
 0xf8c   :  { %v828_v25 = vpop.f32.mrb[8].mxu1 }
 0xf8d   :  { %v832_v26 = vadd.f32 %v828_v25, %v1874_v45  ;;  %v1513_v27 = vpop.f32.mrb[9].mxu1 }
 0xf8f   :  { %1698 = vtanh.f32 %v832_v26  ;;  %v833_v29 = vmul.f32 0.5, %v832_v26 }
 0xf91   :  { %1700 = vtanh.f32 %v833_v29  ;;  %v35_v29 = vld [vmem:[%s2014_s3 + $0x20] sm:$0xff] }
 0xf99   :  { %v1699_v28 = vpop.eup %1698 }
 0xf9a   :  { %840 = vrot.lane.b32.xlu0 %v1699_v28, %s1725_s1  ;;  %v34_v28 = vld [vmem:[%s2014_s3 + $0x18] sm:$0xff] }
 0xf9b   :  { %v1701_v30 = vpop.eup %1700 }
 0xf9c   :  { %v835_v31 = vmul.f32 0.5, %v1701_v30 }
 0xf9e   :  { %v836_v32 = vadd.f32 0.5, %v835_v31  ;;  %v36_v31 = vld [vmem:[%s2014_s3 + $0x28] sm:$0xff] }
 0xfa0   :  { %v838_v35 = vmul.f32 %v836_v32, %v750_v21 }
0x100c   :  { %v841_v33 = vpop.permute.xlu0 %840 }
0x100d   :  { %v843_v34 = vmul.f32 %v841_v33, %v836_v32 }
0x100f   :  { %845 = vrot.lane.b32.xlu1 %v843_v34, %s1726_s29 }
0x1081   :  { %v846_v37 = vpop.permute.xlu1 %845 }
0x1082   :  { %v848_v38 = vadd.f32 %v846_v37, %v838_v35  ;;  %v25_v37 = vld [vmem:[%s2015_s2 + $0x40] sm:$0xff] }
0x1084   :  { %1702 = vtanh.f32 %v848_v38 }
0x108e   :  { %v1703_v40 = vpop.eup %1702 }
0x108f   :  { %851 = vrot.lane.b32.xlu0 %v1703_v40, %s1725_s1 }
0x1101   :  { %v852_v45 = vpop.permute.xlu0 %851 }
0x1102   :  { %v854_v41 = vmul.f32 %v852_v45, %v836_v32  ;;  %v1636_v32 = vpack.c.bf16 %v36_v31, %v35_v29 }
0x1104   :  { %856 = vrot.lane.b32.xlu1 %v854_v41, %s1726_s29  ;;  %v27_v41 = vld [vmem:[%s2015_s2 + $0x50] sm:$0xff] }
0x1176   :  { %v857_v43 = vpop.permute.xlu1 %856 }
0x1177   :  { %1523 = vmatmul.mubr.msk.f32.vlgmr.msra.gmra.mrb[10].mxu1 %vm131_vm2, %v857_v43  ;;  %v28_v43 = vld [vmem:[%s2015_s2 + $0x58] sm:$0xff] }
0x1178   :  { %1622 = vmatpush3.bf16.msra.mxu1 %v1790_v14  ;;  %1533 = vmatprep.mubr.msk.f32.mxu1 %vm1723_vm0, %v1724_v3 }
0x1179   :  { %1623 = vmatprep.subr.bf16.mxu1 %v1722_v0 }
0x117c   :  { %1625 = vmatpush3.bf16.msra.mxu1 %v1800_v17 }
0x117d   :  { %1626 = vmatprep.subr.bf16.mxu1 %v1722_v0 }
0x124a   :  { %v926_v44 = vpop.f32.mrb[10].mxu1 }
0x124b   :  { %v930_v46 = vadd.f32 %v926_v44, %v1876_v48  ;;  %v1524_v47 = vpop.f32.mrb[11].mxu1  ;;  %v1642_v44 = vpack.c.bf16 %v28_v43, %v27_v41 }
0x124d   :  { %1704 = vtanh.f32 %v930_v46  ;;  %v931_v49 = vmul.f32 0.5, %v930_v46  ;;  %v1331_v46 = vld [vmem:[%s2014_s3 + $0x38] ss:$0 sm:$0xff] }
0x124f   :  { %1706 = vtanh.f32 %v931_v49 }
0x1257   :  { %v1705_v36 = vpop.eup %1704 }
0x1258   :  { %938 = vrot.lane.b32.xlu0 %v1705_v36, %s1725_s1 }
0x1259   :  { %v1707_v50 = vpop.eup %1706 }
0x125a   :  { %v933_v52 = vmul.f32 0.5, %v1707_v50 }
0x125c   :  { %v934_v53 = vadd.f32 0.5, %v933_v52 }
0x125e   :  { %v936_v57 = vmul.f32 %v934_v53, %v848_v38  ;;  %v26_v38 = vld [vmem:[%s2015_s2 + $0x48] sm:$0xff] }
0x125f   :  { %v1639_v40 = vpack.c.bf16 %v26_v38, %v25_v37 }
0x12ca   :  { %v939_v55 = vpop.permute.xlu0 %938 }
0x12cb   :  { %v941_v56 = vmul.f32 %v939_v55, %v934_v53 }
0x12cd   :  { %943 = vrot.lane.b32.xlu1 %v941_v56, %s1726_s29 }
0x133f   :  { %v944_v58 = vpop.permute.xlu1 %943 }
0x1340   :  { %v946_v59 = vadd.f32 %v944_v58, %v936_v57 }
0x1342   :  { %1708 = vtanh.f32 %v946_v59 }
0x134c   :  { %v1709_v60 = vpop.eup %1708 }
0x134d   :  { %949 = vrot.lane.b32.xlu0 %v1709_v60, %s1725_s1 }
0x13bf   :  { %v950_v48 = vpop.permute.xlu0 %949 }
0x13c0   :  { %v952_v61 = vmul.f32 %v950_v48, %v934_v53 }
0x13c2   :  { %954 = vrot.lane.b32.xlu1 %v952_v61, %s1726_s29 }
0x1434   :  { %v955_v62 = vpop.permute.xlu1 %954 }
0x1435   :  { %1534 = vmatmul.mubr.msk.f32.vlgmr.msra.gmra.mrb[12].mxu1 %vm131_vm2, %v955_v62 }
0x1436   :  { %1628 = vmatpush3.bf16.msra.mxu1 %v1790_v14  ;;  %1544 = vmatprep.mubr.msk.f32.mxu1 %vm1723_vm0, %v1724_v3 }
0x1437   :  { %1629 = vmatprep.subr.bf16.mxu1 %v1722_v0 }
0x143a   :  { %1631 = vmatpush3.bf16.msra.mxu1 %v1800_v17 }
0x1508   :  { %v1024_v63 = vpop.f32.mrb[12].mxu1 }
0x1509   :  { %v1028_v1 = vadd.f32 %v1024_v63, %v1878_v51  ;;  %v1535_v2 = vpop.f32.mrb[13].mxu1 }
0x150b   :  { %1710 = vtanh.f32 %v1028_v1  ;;  %v1029_v39 = vmul.f32 0.5, %v1028_v1 }
0x150d   :  { %1712 = vtanh.f32 %v1029_v39 }
0x1515   :  { %v1711_v4 = vpop.eup %1710 }
0x1516   :  { %1036 = vrot.lane.b32.xlu0 %v1711_v4, %s1725_s1 }
0x1517   :  { %v1713_v5 = vpop.eup %1712 }
0x1518   :  { %v1031_v6 = vmul.f32 0.5, %v1713_v5 }
0x151a   :  { %v1032_v14 = vadd.f32 0.5, %v1031_v6 }
0x151c   :  { %v1034_v9 = vmul.f32 %v1032_v14, %v946_v59 }
0x1588   :  { %v1037_v7 = vpop.permute.xlu0 %1036 }
0x1589   :  { %v1039_v8 = vmul.f32 %v1037_v7, %v1032_v14 }
0x158b   :  { %1041 = vrot.lane.b32.xlu1 %v1039_v8, %s1726_s29 }
0x15fd   :  { %v1042_v10 = vpop.permute.xlu1 %1041 }
0x15fe   :  { %v1044_v17 = vadd.f32 %v1042_v10, %v1034_v9 }
0x1600   :  { %1714 = vtanh.f32 %v1044_v17 }
0x160a   :  { %v1715_v11 = vpop.eup %1714 }
0x160b   :  { %1047 = vrot.lane.b32.xlu0 %v1715_v11, %s1725_s1 }
0x167d   :  { %v1048_v51 = vpop.permute.xlu0 %1047 }
0x167e   :  { %v1050_v12 = vmul.f32 %v1048_v51, %v1032_v14 }
0x1680   :  { %1052 = vrot.lane.b32.xlu1 %v1050_v12, %s1726_s29 }
0x16f2   :  { %v1053_v13 = vpop.permute.xlu1 %1052 }
0x16f3   :  { %1545 = vmatmul.mubr.msk.f32.vlgmr.msra.gmra.mrb[14].mxu1 %vm131_vm2, %v1053_v13 }
0x17c6   :  { %v1122_v15 = vpop.f32.mrb[14].mxu1 }
0x17c7   :  { %v1126_v16 = vadd.f32 %v1122_v15, %v1880_v54  ;;  %v1546_v18 = vpop.f32.mrb[15].mxu1  ;;  %v33_v54 = vld [vmem:[%s2014_s3 + $0x10] sm:$0xff] }
0x17c8   :  { %v1633_v30 = vpack.c.bf16 %v34_v28, %v33_v54 }
0x17c9   :  { %1716 = vtanh.f32 %v1126_v16  ;;  %v1127_v20 = vmul.f32 0.5, %v1126_v16 }
0x17ca   :  { %1634 = vmatpush3.bf16.msra.mxu0 %v1633_v30 }
0x17cb   :  { %1718 = vtanh.f32 %v1127_v20  ;;  %1635 = vmatprep.subr.bf16.mxu0 %v1722_v0 }
0x17ce   :  { %1637 = vmatpush3.bf16.msra.mxu0 %v1636_v32 }
0x17cf   :  { %1638 = vmatprep.subr.bf16.mxu0 %v1722_v0 }
0x17d3   :  { %v1717_v19 = vpop.eup %1716 }
0x17d4   :  { %1134 = vrot.lane.b32.xlu0 %v1717_v19, %s1725_s1 }
0x17d5   :  { %v1719_v21 = vpop.eup %1718 }
0x17d6   :  { %v1129_v22 = vmul.f32 0.5, %v1719_v21 }
0x17d8   :  { %v1130_v42 = vadd.f32 0.5, %v1129_v22 }
0x17da   :  { %v1132_v25 = vmul.f32 %v1130_v42, %v1044_v17 }
0x1846   :  { %v1135_v23 = vpop.permute.xlu0 %1134 }
0x1847   :  { %v1137_v24 = vmul.f32 %v1135_v23, %v1130_v42 }
0x1849   :  { %1139 = vrot.lane.b32.xlu1 %v1137_v24, %s1726_s29 }
0x18bb   :  { %v1140_v26 = vpop.permute.xlu1 %1139 }
0x18bc   :  { %v1142_v27 = vadd.f32 %v1140_v26, %v1132_v25 }
0x18be   :  { %1720 = vtanh.f32 %v1142_v27 }
0x18c8   :  { %v1721_v33 = vpop.eup %1720 }
0x18c9   :  { %1145 = vrot.lane.b32.xlu0 %v1721_v33, %s1725_s1 }
0x193b   :  { %v1146_v34 = vpop.permute.xlu0 %1145 }
0x193c   :  { %v1148_v35 = vmul.f32 %v1146_v34, %v1130_v42 }
0x193e   :  { %1154 = vrot.lane.b32.xlu1 %v1148_v35, %s1726_s29 }
0x19b0   :  { %v1155_v45 = vpop.permute.xlu1 %1154 }
0x19b1   :  { %1556 = vmatmul.mubr.msk.f32.vlgmr.msra.gmra.mrb[20].mxu0 %vm131_vm2, %v1155_v45 }
0x19b2   :  { %1640 = vmatpush3.bf16.msra.mxu0 %v1639_v40  ;;  %1566 = vmatprep.mubr.msk.f32.mxu0 %vm1723_vm0, %v1724_v3 }
0x19b3   :  { %1641 = vmatprep.subr.bf16.mxu0 %v1722_v0  ;;  %v1333_v0 = vld [vmem:[%s2015_s2 + $0x68] ss:$0 sm:$0xff] }
0x19b6   :  { %1643 = vmatpush3.bf16.msra.mxu0 %v1642_v44 }
0x1a84   :  { %v1224_v47 = vpop.f32.mrb[20].mxu0 }
0x1a85   :  { %v1225_v36 = vadd.f32 %v1331_v46, %v1224_v47  ;;  %v1557_v49 = vpop.f32.mrb[21].mxu0 }
0x1a87   :  { %v1228_v3 = vmax.f32 %v1225_v36, 0.0 }
0x1a89   :  { %1567 = vmatmul.mubr.msk.f32.vlgmr.msra.gmra.mrb[22].mxu0 %vm131_vm2, %v1228_v3 }
0x1b5c   :  { %v1302_v50 = vpop.f32.mrb[22].mxu0 }
0x1b5d   :  { %v1303_v52 = vadd.f32 %v1333_v0, %v1302_v50  ;;  %v1568_v53 = vpop.f32.mrb[23].mxu0 }
0x1b5f   :  { %1306 = vst [vmem:[%s2018_s4] sm:$0xff] %v1303_v52 }

</bundles_post_ra>
